<compile_context>
chip_gen: v7x
topology: tpu7x:2x2x1
jax: 0.10.0
libtpu: 0.0.40
codegen_flags: <defaults>
</compile_context>

<pallas_src>
import functools
import math

import jax
import jax.numpy as jnp
from jax.experimental import pallas as pl
from jax.experimental.pallas import tpu as pltpu


def _gelu_tanh(x):
    # TODO(synk): PyTorch nn.GELU() default is the exact erf-based GELU; the
    # tanh approximation is used here (abs diff ~1e-3) since erf has no
    # guaranteed Mosaic lowering. The pure-JAX reference below uses the same
    # approximation so the correctness check is exact-to-tolerance.
    c = math.sqrt(2.0 / math.pi)
    return 0.5 * x * (1.0 + jnp.tanh(c * (x + 0.044715 * x * x * x)))


def _bottleneck_kernel(x_ref, dw_ref, gnw_ref, gnb_ref, w1_ref, b1_ref,
                       w2_ref, b2_ref, gamma_ref, o_ref, *, kernel_size, eps):
    # x_ref: (1, C, L) one full sample, channel on sublanes, length on lanes.
    x = x_ref[0].astype(jnp.float32)                 # (C, L)
    C, L = x.shape
    K = kernel_size
    half = (K - 1) // 2                              # 'same' zero padding (odd K)

    # ---- depthwise Conv1d (groups=C, no bias) ------------------------------
    dw = dw_ref[...]                                 # (C, K)
    col = jax.lax.broadcasted_iota(jnp.int32, (C, L), 1)
    y = jnp.zeros((C, L), jnp.float32)
    for k in range(K):                               # K=7, unrolled at trace time
        offset = k - half                            # tap reads x[:, l + offset]
        if offset == 0:
            tap = x
        else:
            shifted = pltpu.roll(x, shift=(-offset) % L, axis=1)   # lane roll (XLU)
            valid = (col + offset >= 0) & (col + offset < L)
            tap = jnp.where(valid, shifted, 0.0)     # zero 'same' padding
        y = y + tap * dw[:, k:k + 1]

    # ---- GroupNorm(num_groups=1): normalize over (C, L) per sample ---------
    mean = jnp.mean(y, keepdims=True)                # (1, 1)
    var = jnp.mean((y - mean) ** 2, keepdims=True)   # biased variance (PyTorch)
    y = (y - mean) * jax.lax.rsqrt(var + eps)
    y = y * gnw_ref[...] + gnb_ref[...]              # per-channel affine, (C, 1)

    # ---- 1x1 conv (C -> E) + GELU ------------------------------------------
    h = jnp.dot(w1_ref[...], y, preferred_element_type=jnp.float32) + b1_ref[...]   # (E, L)
    h = _gelu_tanh(h)

    # ---- 1x1 conv (E -> C_out) ---------------------------------------------
    z = jnp.dot(w2_ref[...], h, preferred_element_type=jnp.float32) + b2_ref[...]   # (C_out, L)

    # ---- LayerScaler + StochasticDepth(p=0) + residual ----------------------
    # TODO(synk): StochasticDepth(drop_p=0.0, mode='batch') is identity in this
    # forward; training-time batch drop-path is not implemented.
    z = z * gamma_ref[...]                           # per-channel gamma, (C_out, 1)
    o_ref[0] = (z + x).astype(o_ref.dtype)


def bottleneck_block(x, params, *, kernel_size=7, eps=1e-5):
    """x: (B, C_in, L) as in the PyTorch module. Returns (B, C_out, L)."""
    assert kernel_size % 2 == 1, "'same' padding assumes an odd kernel size"
    B, C_in, L = x.shape

    dw = params["dw_weight"].reshape(C_in, kernel_size)          # (C_in, K)
    gn_w = params["gn_weight"].reshape(C_in, 1)
    gn_b = params["gn_bias"].reshape(C_in, 1)
    w1 = params["pw1_weight"]
    w1 = w1.reshape(w1.shape[0], C_in)                           # (E, C_in)
    E = w1.shape[0]
    b1 = params["pw1_bias"].reshape(E, 1)
    w2 = params["pw2_weight"]
    w2 = w2.reshape(w2.shape[0], E)                              # (C_out, E)
    C_out = w2.shape[0]
    b2 = params["pw2_bias"].reshape(C_out, 1)
    gamma = params["gamma"].reshape(C_out, 1)
    assert C_out == C_in, "residual add requires in_features == out_features"

    kernel = functools.partial(_bottleneck_kernel, kernel_size=kernel_size, eps=eps)

    return pl.pallas_call(
        kernel,
        out_shape=jax.ShapeDtypeStruct((B, C_out, L), x.dtype),
        grid_spec=pltpu.PrefetchScalarGridSpec(
            num_scalar_prefetch=0,
            grid=(B,),
            in_specs=[
                pl.BlockSpec((1, C_in, L), lambda b: (b, 0, 0)),       # x sample
                pl.BlockSpec((C_in, kernel_size), lambda b: (0, 0)),   # dw taps (resident)
                pl.BlockSpec((C_in, 1), lambda b: (0, 0)),             # GN weight
                pl.BlockSpec((C_in, 1), lambda b: (0, 0)),             # GN bias
                pl.BlockSpec((E, C_in), lambda b: (0, 0)),             # 1x1 conv #1 weight
                pl.BlockSpec((E, 1), lambda b: (0, 0)),                # 1x1 conv #1 bias
                pl.BlockSpec((C_out, E), lambda b: (0, 0)),            # 1x1 conv #2 weight
                pl.BlockSpec((C_out, 1), lambda b: (0, 0)),            # 1x1 conv #2 bias
                pl.BlockSpec((C_out, 1), lambda b: (0, 0)),            # layer-scale gamma
            ],
            out_specs=pl.BlockSpec((1, C_out, L), lambda b: (b, 0, 0)),
        ),
        compiler_params=pltpu.CompilerParams(
            dimension_semantics=("parallel",),
            vmem_limit_bytes=48 * 1024 * 1024,   # < 64 MiB so it also fits v7x
        ),
    )(x, dw, gn_w, gn_b, w1, b1, w2, b2, gamma)


def bottleneck_ref(x, params, *, kernel_size=7, eps=1e-5):
    """Pure-JAX reference of the PyTorch forward (same tanh-GELU)."""
    B, C, L = x.shape
    dw = params["dw_weight"].reshape(C, kernel_size)
    gn_w, gn_b = params["gn_weight"], params["gn_bias"]
    w1 = params["pw1_weight"].reshape(-1, C)
    b1 = params["pw1_bias"]
    E = w1.shape[0]
    w2 = params["pw2_weight"].reshape(-1, E)
    b2 = params["pw2_bias"]
    gamma = params["gamma"]

    res = x
    half = (kernel_size - 1) // 2
    xp = jnp.pad(x, ((0, 0), (0, 0), (half, kernel_size - 1 - half)))
    y = sum(xp[:, :, k:k + L] * dw[None, :, k:k + 1] for k in range(kernel_size))
    mean = jnp.mean(y, axis=(1, 2), keepdims=True)
    var = jnp.mean((y - mean) ** 2, axis=(1, 2), keepdims=True)
    y = (y - mean) / jnp.sqrt(var + eps)
    y = y * gn_w[None, :, None] + gn_b[None, :, None]
    h = jnp.einsum("bcl,ec->bel", y, w1) + b1[None, :, None]
    h = _gelu_tanh(h)
    z = jnp.einsum("bel,ce->bcl", h, w2) + b2[None, :, None]
    z = gamma[None, :, None] * z
    return z + res


if __name__ == "__main__":
    key = jax.random.PRNGKey(0)
    keys = jax.random.split(key, 9)

    B, C, L = 2, 32, 16           # batch, in_features (= out_features), length
    K = 7
    expansion = 2
    E = C * expansion

    x = jax.random.normal(keys[0], (B, C, L), dtype=jnp.float32)
    params = {
        "dw_weight": 0.2 * jax.random.normal(keys[1], (C, 1, K), jnp.float32),
        "gn_weight": 1.0 + 0.1 * jax.random.normal(keys[2], (C,), jnp.float32),
        "gn_bias": 0.1 * jax.random.normal(keys[3], (C,), jnp.float32),
        "pw1_weight": 0.2 * jax.random.normal(keys[4], (E, C, 1), jnp.float32),
        "pw1_bias": 0.1 * jax.random.normal(keys[5], (E,), jnp.float32),
        "pw2_weight": 0.2 * jax.random.normal(keys[6], (C, E, 1), jnp.float32),
        "pw2_bias": 0.1 * jax.random.normal(keys[7], (C,), jnp.float32),
        # Module init is layer_scaler_init_value * ones; use nonzero per-channel
        # values here (as after training) so the scale path is exercised.
        "gamma": 0.1 * jax.random.normal(keys[8], (C,), jnp.float32),
    }

    out = bottleneck_block(x, params, kernel_size=K)
    out = jax.block_until_ready(out)

    ref = bottleneck_ref(x, params, kernel_size=K)
    assert out.shape == x.shape
    max_err = float(jnp.max(jnp.abs(out - ref)))
    assert jnp.allclose(out, ref, atol=1e-4, rtol=1e-4), f"max abs err {max_err}"

    print("KERNEL_OK")
</pallas_src>

<mosaic_0001>
module attributes {stable_mosaic.version = 11 : i64} {
  func.func @_bottleneck_kernel(%arg0: i32, %arg1: memref<1x32x16xf32, #tpu.memory_space<vmem>>, %arg2: memref<32x7xf32, #tpu.memory_space<vmem>>, %arg3: memref<32x1xf32, #tpu.memory_space<vmem>>, %arg4: memref<32x1xf32, #tpu.memory_space<vmem>>, %arg5: memref<64x32xf32, #tpu.memory_space<vmem>>, %arg6: memref<64x1xf32, #tpu.memory_space<vmem>>, %arg7: memref<32x64xf32, #tpu.memory_space<vmem>>, %arg8: memref<32x1xf32, #tpu.memory_space<vmem>>, %arg9: memref<32x1xf32, #tpu.memory_space<vmem>>, %arg10: memref<1x32x16xf32, #tpu.memory_space<vmem>>) attributes {dimension_semantics = [#tpu.dimension_semantics<parallel>], iteration_bounds = array<i64: 2>, scalar_prefetch = 0 : i64, scratch_operands = 0 : i64, tpu.core_type = #tpu.core_type<tc>, window_params = [{transform_indices = @transform_0, window_bounds = array<i64: 1, 32, 16>}, {pipeline_mode = #tpu.pipeline_mode<synchronous>, transform_indices = @transform_1, window_bounds = array<i64: 32, 7>}, {pipeline_mode = #tpu.pipeline_mode<synchronous>, transform_indices = @transform_2, window_bounds = array<i64: 32, 1>}, {pipeline_mode = #tpu.pipeline_mode<synchronous>, transform_indices = @transform_3, window_bounds = array<i64: 32, 1>}, {pipeline_mode = #tpu.pipeline_mode<synchronous>, transform_indices = @transform_4, window_bounds = array<i64: 64, 32>}, {pipeline_mode = #tpu.pipeline_mode<synchronous>, transform_indices = @transform_5, window_bounds = array<i64: 64, 1>}, {pipeline_mode = #tpu.pipeline_mode<synchronous>, transform_indices = @transform_6, window_bounds = array<i64: 32, 64>}, {pipeline_mode = #tpu.pipeline_mode<synchronous>, transform_indices = @transform_7, window_bounds = array<i64: 32, 1>}, {pipeline_mode = #tpu.pipeline_mode<synchronous>, transform_indices = @transform_8, window_bounds = array<i64: 32, 1>}, {transform_indices = @transform_9, window_bounds = array<i64: 1, 32, 16>}]} {
    %c0 = arith.constant 0 : index
    %c0_0 = arith.constant 0 : index
    %c0_1 = arith.constant 0 : index
    %0 = vector.load %arg1[%c0, %c0_0, %c0_1] : memref<1x32x16xf32, #tpu.memory_space<vmem>>, vector<1x32x16xf32>
    %1 = vector.shape_cast %0 : vector<1x32x16xf32> to vector<32x16xf32>
    %c0_2 = arith.constant 0 : index
    %c0_3 = arith.constant 0 : index
    %2 = vector.load %arg2[%c0_2, %c0_3] : memref<32x7xf32, #tpu.memory_space<vmem>>, vector<32x7xf32>
    %3 = tpu.iota {dimensions = array<i32: 1>} : vector<32x16xi32>
    %cst = arith.constant 0.000000e+00 : f32
    %4 = vector.broadcast %cst : f32 to vector<32x16xf32>
    %c3_i32 = arith.constant 3 : i32
    %5 = tpu.dynamic_rotate %1 by %c3_i32 dim 1 : vector<32x16xf32>, i32 -> vector<32x16xf32>
    %c-3_i32 = arith.constant -3 : i32
    %6 = vector.broadcast %c-3_i32 : i32 to vector<32x16xi32>
    %7 = arith.addi %3, %6 : vector<32x16xi32>
    %c0_i32 = arith.constant 0 : i32
    %8 = vector.broadcast %c0_i32 : i32 to vector<32x16xi32>
    %9 = arith.cmpi sge, %7, %8 : vector<32x16xi32>
    %c-3_i32_4 = arith.constant -3 : i32
    %10 = vector.broadcast %c-3_i32_4 : i32 to vector<32x16xi32>
    %11 = arith.addi %3, %10 : vector<32x16xi32>
    %c16_i32 = arith.constant 16 : i32
    %12 = vector.broadcast %c16_i32 : i32 to vector<32x16xi32>
    %13 = arith.cmpi slt, %11, %12 : vector<32x16xi32>
    %14 = arith.andi %9, %13 : vector<32x16xi1>
    %cst_5 = arith.constant 0.000000e+00 : f32
    %15 = vector.broadcast %cst_5 : f32 to vector<32x16xf32>
    %16 = arith.select %14, %5, %15 : vector<32x16xi1>, vector<32x16xf32>
    %17 = vector.extract_strided_slice %2 {offsets = [0, 0], sizes = [32, 1], strides = [1, 1]} : vector<32x7xf32> to vector<32x1xf32>
    %18 = vector.broadcast %17 : vector<32x1xf32> to vector<32x16xf32>
    %19 = arith.mulf %16, %18 : vector<32x16xf32>
    %20 = arith.addf %4, %19 : vector<32x16xf32>
    %c2_i32 = arith.constant 2 : i32
    %21 = tpu.dynamic_rotate %1 by %c2_i32 dim 1 : vector<32x16xf32>, i32 -> vector<32x16xf32>
    %c-2_i32 = arith.constant -2 : i32
    %22 = vector.broadcast %c-2_i32 : i32 to vector<32x16xi32>
    %23 = arith.addi %3, %22 : vector<32x16xi32>
    %c0_i32_6 = arith.constant 0 : i32
    %24 = vector.broadcast %c0_i32_6 : i32 to vector<32x16xi32>
    %25 = arith.cmpi sge, %23, %24 : vector<32x16xi32>
    %c-2_i32_7 = arith.constant -2 : i32
    %26 = vector.broadcast %c-2_i32_7 : i32 to vector<32x16xi32>
    %27 = arith.addi %3, %26 : vector<32x16xi32>
    %c16_i32_8 = arith.constant 16 : i32
    %28 = vector.broadcast %c16_i32_8 : i32 to vector<32x16xi32>
    %29 = arith.cmpi slt, %27, %28 : vector<32x16xi32>
    %30 = arith.andi %25, %29 : vector<32x16xi1>
    %cst_9 = arith.constant 0.000000e+00 : f32
    %31 = vector.broadcast %cst_9 : f32 to vector<32x16xf32>
    %32 = arith.select %30, %21, %31 : vector<32x16xi1>, vector<32x16xf32>
    %33 = vector.extract_strided_slice %2 {offsets = [0, 1], sizes = [32, 1], strides = [1, 1]} : vector<32x7xf32> to vector<32x1xf32>
    %34 = vector.broadcast %33 : vector<32x1xf32> to vector<32x16xf32>
    %35 = arith.mulf %32, %34 : vector<32x16xf32>
    %36 = arith.addf %20, %35 : vector<32x16xf32>
    %c1_i32 = arith.constant 1 : i32
    %37 = tpu.dynamic_rotate %1 by %c1_i32 dim 1 : vector<32x16xf32>, i32 -> vector<32x16xf32>
    %c-1_i32 = arith.constant -1 : i32
    %38 = vector.broadcast %c-1_i32 : i32 to vector<32x16xi32>
    %39 = arith.addi %3, %38 : vector<32x16xi32>
    %c0_i32_10 = arith.constant 0 : i32
    %40 = vector.broadcast %c0_i32_10 : i32 to vector<32x16xi32>
    %41 = arith.cmpi sge, %39, %40 : vector<32x16xi32>
    %c-1_i32_11 = arith.constant -1 : i32
    %42 = vector.broadcast %c-1_i32_11 : i32 to vector<32x16xi32>
    %43 = arith.addi %3, %42 : vector<32x16xi32>
    %c16_i32_12 = arith.constant 16 : i32
    %44 = vector.broadcast %c16_i32_12 : i32 to vector<32x16xi32>
    %45 = arith.cmpi slt, %43, %44 : vector<32x16xi32>
    %46 = arith.andi %41, %45 : vector<32x16xi1>
    %cst_13 = arith.constant 0.000000e+00 : f32
    %47 = vector.broadcast %cst_13 : f32 to vector<32x16xf32>
    %48 = arith.select %46, %37, %47 : vector<32x16xi1>, vector<32x16xf32>
    %49 = vector.extract_strided_slice %2 {offsets = [0, 2], sizes = [32, 1], strides = [1, 1]} : vector<32x7xf32> to vector<32x1xf32>
    %50 = vector.broadcast %49 : vector<32x1xf32> to vector<32x16xf32>
    %51 = arith.mulf %48, %50 : vector<32x16xf32>
    %52 = arith.addf %36, %51 : vector<32x16xf32>
    %53 = vector.extract_strided_slice %2 {offsets = [0, 3], sizes = [32, 1], strides = [1, 1]} : vector<32x7xf32> to vector<32x1xf32>
    %54 = vector.broadcast %53 : vector<32x1xf32> to vector<32x16xf32>
    %55 = arith.mulf %1, %54 : vector<32x16xf32>
    %56 = arith.addf %52, %55 : vector<32x16xf32>
    %c15_i32 = arith.constant 15 : i32
    %57 = tpu.dynamic_rotate %1 by %c15_i32 dim 1 : vector<32x16xf32>, i32 -> vector<32x16xf32>
    %c1_i32_14 = arith.constant 1 : i32
    %58 = vector.broadcast %c1_i32_14 : i32 to vector<32x16xi32>
    %59 = arith.addi %3, %58 : vector<32x16xi32>
    %c0_i32_15 = arith.constant 0 : i32
    %60 = vector.broadcast %c0_i32_15 : i32 to vector<32x16xi32>
    %61 = arith.cmpi sge, %59, %60 : vector<32x16xi32>
    %c1_i32_16 = arith.constant 1 : i32
    %62 = vector.broadcast %c1_i32_16 : i32 to vector<32x16xi32>
    %63 = arith.addi %3, %62 : vector<32x16xi32>
    %c16_i32_17 = arith.constant 16 : i32
    %64 = vector.broadcast %c16_i32_17 : i32 to vector<32x16xi32>
    %65 = arith.cmpi slt, %63, %64 : vector<32x16xi32>
    %66 = arith.andi %61, %65 : vector<32x16xi1>
    %cst_18 = arith.constant 0.000000e+00 : f32
    %67 = vector.broadcast %cst_18 : f32 to vector<32x16xf32>
    %68 = arith.select %66, %57, %67 : vector<32x16xi1>, vector<32x16xf32>
    %69 = vector.extract_strided_slice %2 {offsets = [0, 4], sizes = [32, 1], strides = [1, 1]} : vector<32x7xf32> to vector<32x1xf32>
    %70 = vector.broadcast %69 : vector<32x1xf32> to vector<32x16xf32>
    %71 = arith.mulf %68, %70 : vector<32x16xf32>
    %72 = arith.addf %56, %71 : vector<32x16xf32>
    %c14_i32 = arith.constant 14 : i32
    %73 = tpu.dynamic_rotate %1 by %c14_i32 dim 1 : vector<32x16xf32>, i32 -> vector<32x16xf32>
    %c2_i32_19 = arith.constant 2 : i32
    %74 = vector.broadcast %c2_i32_19 : i32 to vector<32x16xi32>
    %75 = arith.addi %3, %74 : vector<32x16xi32>
    %c0_i32_20 = arith.constant 0 : i32
    %76 = vector.broadcast %c0_i32_20 : i32 to vector<32x16xi32>
    %77 = arith.cmpi sge, %75, %76 : vector<32x16xi32>
    %c2_i32_21 = arith.constant 2 : i32
    %78 = vector.broadcast %c2_i32_21 : i32 to vector<32x16xi32>
    %79 = arith.addi %3, %78 : vector<32x16xi32>
    %c16_i32_22 = arith.constant 16 : i32
    %80 = vector.broadcast %c16_i32_22 : i32 to vector<32x16xi32>
    %81 = arith.cmpi slt, %79, %80 : vector<32x16xi32>
    %82 = arith.andi %77, %81 : vector<32x16xi1>
    %cst_23 = arith.constant 0.000000e+00 : f32
    %83 = vector.broadcast %cst_23 : f32 to vector<32x16xf32>
    %84 = arith.select %82, %73, %83 : vector<32x16xi1>, vector<32x16xf32>
    %85 = vector.extract_strided_slice %2 {offsets = [0, 5], sizes = [32, 1], strides = [1, 1]} : vector<32x7xf32> to vector<32x1xf32>
    %86 = vector.broadcast %85 : vector<32x1xf32> to vector<32x16xf32>
    %87 = arith.mulf %84, %86 : vector<32x16xf32>
    %88 = arith.addf %72, %87 : vector<32x16xf32>
    %c13_i32 = arith.constant 13 : i32
    %89 = tpu.dynamic_rotate %1 by %c13_i32 dim 1 : vector<32x16xf32>, i32 -> vector<32x16xf32>
    %c3_i32_24 = arith.constant 3 : i32
    %90 = vector.broadcast %c3_i32_24 : i32 to vector<32x16xi32>
    %91 = arith.addi %3, %90 : vector<32x16xi32>
    %c0_i32_25 = arith.constant 0 : i32
    %92 = vector.broadcast %c0_i32_25 : i32 to vector<32x16xi32>
    %93 = arith.cmpi sge, %91, %92 : vector<32x16xi32>
    %c3_i32_26 = arith.constant 3 : i32
    %94 = vector.broadcast %c3_i32_26 : i32 to vector<32x16xi32>
    %95 = arith.addi %3, %94 : vector<32x16xi32>
    %c16_i32_27 = arith.constant 16 : i32
    %96 = vector.broadcast %c16_i32_27 : i32 to vector<32x16xi32>
    %97 = arith.cmpi slt, %95, %96 : vector<32x16xi32>
    %98 = arith.andi %93, %97 : vector<32x16xi1>
    %cst_28 = arith.constant 0.000000e+00 : f32
    %99 = vector.broadcast %cst_28 : f32 to vector<32x16xf32>
    %100 = arith.select %98, %89, %99 : vector<32x16xi1>, vector<32x16xf32>
    %101 = vector.extract_strided_slice %2 {offsets = [0, 6], sizes = [32, 1], strides = [1, 1]} : vector<32x7xf32> to vector<32x1xf32>
    %102 = vector.broadcast %101 : vector<32x1xf32> to vector<32x16xf32>
    %103 = arith.mulf %100, %102 : vector<32x16xf32>
    %104 = arith.addf %88, %103 : vector<32x16xf32>
    %105 = vector.shape_cast %104 : vector<32x16xf32> to vector<1x32x16xf32>
    %cst_29 = arith.constant dense<0.000000e+00> : vector<1xf32>
    %106 = vector.multi_reduction <add>, %105, %cst_29 [1, 2] : vector<1x32x16xf32> to vector<1xf32>
    %107 = vector.shape_cast %106 : vector<1xf32> to vector<1x1x1xf32>
    %108 = vector.extract %107[0, 0, 0] : f32 from vector<1x1x1xf32>
    %109 = vector.broadcast %108 : f32 to vector<1x1xf32>
    %cst_30 = arith.constant 5.120000e+02 : f32
    %110 = vector.broadcast %cst_30 : f32 to vector<1x1xf32>
    %111 = arith.divf %109, %110 : vector<1x1xf32>
    %112 = vector.broadcast %111 : vector<1x1xf32> to vector<32x16xf32>
    %113 = arith.subf %104, %112 : vector<32x16xf32>
    %114 = arith.mulf %113, %113 : vector<32x16xf32>
    %115 = vector.shape_cast %114 : vector<32x16xf32> to vector<1x32x16xf32>
    %cst_31 = arith.constant dense<0.000000e+00> : vector<1xf32>
    %116 = vector.multi_reduction <add>, %115, %cst_31 [1, 2] : vector<1x32x16xf32> to vector<1xf32>
    %117 = vector.shape_cast %116 : vector<1xf32> to vector<1x1x1xf32>
    %118 = vector.extract %117[0, 0, 0] : f32 from vector<1x1x1xf32>
    %119 = vector.broadcast %118 : f32 to vector<1x1xf32>
    %cst_32 = arith.constant 5.120000e+02 : f32
    %120 = vector.broadcast %cst_32 : f32 to vector<1x1xf32>
    %121 = arith.divf %119, %120 : vector<1x1xf32>
    %122 = vector.broadcast %111 : vector<1x1xf32> to vector<32x16xf32>
    %123 = arith.subf %104, %122 : vector<32x16xf32>
    %cst_33 = arith.constant 9.99999974E-6 : f32
    %124 = vector.broadcast %cst_33 : f32 to vector<1x1xf32>
    %125 = arith.addf %121, %124 : vector<1x1xf32>
    %126 = math.rsqrt %125 : vector<1x1xf32>
    %127 = vector.broadcast %126 : vector<1x1xf32> to vector<32x16xf32>
    %128 = arith.mulf %123, %127 : vector<32x16xf32>
    %c0_34 = arith.constant 0 : index
    %c0_35 = arith.constant 0 : index
    %129 = vector.load %arg3[%c0_34, %c0_35] : memref<32x1xf32, #tpu.memory_space<vmem>>, vector<32x1xf32>
    %130 = vector.broadcast %129 : vector<32x1xf32> to vector<32x16xf32>
    %131 = arith.mulf %128, %130 : vector<32x16xf32>
    %c0_36 = arith.constant 0 : index
    %c0_37 = arith.constant 0 : index
    %132 = vector.load %arg4[%c0_36, %c0_37] : memref<32x1xf32, #tpu.memory_space<vmem>>, vector<32x1xf32>
    %133 = vector.broadcast %132 : vector<32x1xf32> to vector<32x16xf32>
    %134 = arith.addf %131, %133 : vector<32x16xf32>
    %c0_38 = arith.constant 0 : index
    %c0_39 = arith.constant 0 : index
    %135 = vector.load %arg5[%c0_38, %c0_39] : memref<64x32xf32, #tpu.memory_space<vmem>>, vector<64x32xf32>
    %cst_40 = arith.constant dense<0.000000e+00> : vector<64x16xf32>
    %136 = tpu.matmul %135, %134, %cst_40 {dimension_numbers = #tpu.dot_dimension_numbers<[1], [0], [0], [1], [0, 0, 1, 1], [], []>} : vector<64x32xf32>, vector<32x16xf32>, vector<64x16xf32> -> vector<64x16xf32>
    %c0_41 = arith.constant 0 : index
    %c0_42 = arith.constant 0 : index
    %137 = vector.load %arg6[%c0_41, %c0_42] : memref<64x1xf32, #tpu.memory_space<vmem>>, vector<64x1xf32>
    %138 = vector.broadcast %137 : vector<64x1xf32> to vector<64x16xf32>
    %139 = arith.addf %136, %138 : vector<64x16xf32>
    %cst_43 = arith.constant 5.000000e-01 : f32
    %140 = vector.broadcast %cst_43 : f32 to vector<64x16xf32>
    %141 = arith.mulf %140, %139 : vector<64x16xf32>
    %cst_44 = arith.constant 4.471500e-02 : f32
    %142 = vector.broadcast %cst_44 : f32 to vector<64x16xf32>
    %143 = arith.mulf %142, %139 : vector<64x16xf32>
    %144 = arith.mulf %143, %139 : vector<64x16xf32>
    %145 = arith.mulf %144, %139 : vector<64x16xf32>
    %146 = arith.addf %139, %145 : vector<64x16xf32>
    %cst_45 = arith.constant 0.797884583 : f32
    %147 = vector.broadcast %cst_45 : f32 to vector<64x16xf32>
    %148 = arith.mulf %147, %146 : vector<64x16xf32>
    %149 = math.tanh %148 : vector<64x16xf32>
    %cst_46 = arith.constant 1.000000e+00 : f32
    %150 = vector.broadcast %cst_46 : f32 to vector<64x16xf32>
    %151 = arith.addf %150, %149 : vector<64x16xf32>
    %152 = arith.mulf %141, %151 : vector<64x16xf32>
    %c0_47 = arith.constant 0 : index
    %c0_48 = arith.constant 0 : index
    %153 = vector.load %arg7[%c0_47, %c0_48] : memref<32x64xf32, #tpu.memory_space<vmem>>, vector<32x64xf32>
    %cst_49 = arith.constant dense<0.000000e+00> : vector<32x16xf32>
    %154 = tpu.matmul %153, %152, %cst_49 {dimension_numbers = #tpu.dot_dimension_numbers<[1], [0], [0], [1], [0, 0, 1, 1], [], []>} : vector<32x64xf32>, vector<64x16xf32>, vector<32x16xf32> -> vector<32x16xf32>
    %c0_50 = arith.constant 0 : index
    %c0_51 = arith.constant 0 : index
    %155 = vector.load %arg8[%c0_50, %c0_51] : memref<32x1xf32, #tpu.memory_space<vmem>>, vector<32x1xf32>
    %156 = vector.broadcast %155 : vector<32x1xf32> to vector<32x16xf32>
    %157 = arith.addf %154, %156 : vector<32x16xf32>
    %c0_52 = arith.constant 0 : index
    %c0_53 = arith.constant 0 : index
    %158 = vector.load %arg9[%c0_52, %c0_53] : memref<32x1xf32, #tpu.memory_space<vmem>>, vector<32x1xf32>
    %159 = vector.broadcast %158 : vector<32x1xf32> to vector<32x16xf32>
    %160 = arith.mulf %157, %159 : vector<32x16xf32>
    %161 = arith.addf %160, %1 : vector<32x16xf32>
    %c0_54 = arith.constant 0 : index
    %c0_55 = arith.constant 0 : index
    %c0_56 = arith.constant 0 : index
    %162 = vector.load %arg10[%c0_54, %c0_55, %c0_56] : memref<1x32x16xf32, #tpu.memory_space<vmem>>, vector<1x32x16xf32>
    %163 = vector.shape_cast %162 : vector<1x32x16xf32> to vector<32x16xf32>
    %164 = vector.shape_cast %161 : vector<32x16xf32> to vector<1x32x16xf32>
    tpu.vector_store %arg10[%c0_54, %c0_55, %c0_56], %164 {strides = array<i32>} : memref<1x32x16xf32, #tpu.memory_space<vmem>>, vector<1x32x16xf32>,
    return
  }
  func.func @transform_0(%arg0: i32) -> (i32, i32, i32) {
    %c0_i32 = arith.constant 0 : i32
    %c0_i32_0 = arith.constant 0 : i32
    %c0_i32_1 = arith.constant 0 : i32
    return %arg0, %c0_i32, %c0_i32_0 : i32, i32, i32
  }
  func.func @transform_1(%arg0: i32) -> (i32, i32) {
    %c0_i32 = arith.constant 0 : i32
    %c0_i32_0 = arith.constant 0 : i32
    %c0_i32_1 = arith.constant 0 : i32
    return %c0_i32, %c0_i32_0 : i32, i32
  }
  func.func @transform_2(%arg0: i32) -> (i32, i32) {
    %c0_i32 = arith.constant 0 : i32
    %c0_i32_0 = arith.constant 0 : i32
    %c0_i32_1 = arith.constant 0 : i32
    return %c0_i32, %c0_i32_0 : i32, i32
  }
  func.func @transform_3(%arg0: i32) -> (i32, i32) {
    %c0_i32 = arith.constant 0 : i32
    %c0_i32_0 = arith.constant 0 : i32
    %c0_i32_1 = arith.constant 0 : i32
    return %c0_i32, %c0_i32_0 : i32, i32
  }
  func.func @transform_4(%arg0: i32) -> (i32, i32) {
    %c0_i32 = arith.constant 0 : i32
    %c0_i32_0 = arith.constant 0 : i32
    %c0_i32_1 = arith.constant 0 : i32
    return %c0_i32, %c0_i32_0 : i32, i32
  }
  func.func @transform_5(%arg0: i32) -> (i32, i32) {
    %c0_i32 = arith.constant 0 : i32
    %c0_i32_0 = arith.constant 0 : i32
    %c0_i32_1 = arith.constant 0 : i32
    return %c0_i32, %c0_i32_0 : i32, i32
  }
  func.func @transform_6(%arg0: i32) -> (i32, i32) {
    %c0_i32 = arith.constant 0 : i32
    %c0_i32_0 = arith.constant 0 : i32
    %c0_i32_1 = arith.constant 0 : i32
    return %c0_i32, %c0_i32_0 : i32, i32
  }
  func.func @transform_7(%arg0: i32) -> (i32, i32) {
    %c0_i32 = arith.constant 0 : i32
    %c0_i32_0 = arith.constant 0 : i32
    %c0_i32_1 = arith.constant 0 : i32
    return %c0_i32, %c0_i32_0 : i32, i32
  }
  func.func @transform_8(%arg0: i32) -> (i32, i32) {
    %c0_i32 = arith.constant 0 : i32
    %c0_i32_0 = arith.constant 0 : i32
    %c0_i32_1 = arith.constant 0 : i32
    return %c0_i32, %c0_i32_0 : i32, i32
  }
  func.func @transform_9(%arg0: i32) -> (i32, i32, i32) {
    %c0_i32 = arith.constant 0 : i32
    %c0_i32_0 = arith.constant 0 : i32
    %c0_i32_1 = arith.constant 0 : i32
    return %arg0, %c0_i32, %c0_i32_0 : i32, i32, i32
  }
}

</mosaic_0001>

<bundles_post_ra>
// kernel: tpu_custom_call.1
= control target key start
LH: loop header
LB: loop body
LE: loop exit
PB: predicated region body
PF: predicated region fallthrough
CT: control target
= control target key end

     0   :  { %s1503_s30 = smov 0   ;;  %s1945_s0 = inlined_call_operand.vmem [shape: f32[2,32,16], index: 0, kind: input, shape index: {}]   ;;  %s1946_s1 = inlined_call_operand.vmem [shape: f32[32,7], index: 1, kind: input, shape index: {}]   ;;  %s1947_s2 = inlined_call_operand.vmem [shape: f32[32,1], index: 2, kind: input, shape index: {}]   ;;  %s1948_s3 = inlined_call_operand.vmem [shape: f32[32,1], index: 3, kind: input, shape index: {}]   ;;  %s1949_s4 = inlined_call_operand.vmem [shape: f32[64,32], index: 4, kind: input, shape index: {}]   ;;  %s1950_s5 = inlined_call_operand.vmem [shape: f32[64,1], index: 5, kind: input, shape index: {}]   ;;  %s1951_s6 = inlined_call_operand.vmem [shape: f32[32,64], index: 6, kind: input, shape index: {}]   ;;  %s1952_s7 = inlined_call_operand.vmem [shape: f32[32,1], index: 7, kind: input, shape index: {}]   ;;  %s1953_s8 = inlined_call_operand.vmem [shape: f32[32,1], index: 8, kind: input, shape index: {}]   ;;  %s1954_s9 = inlined_call_operand.vmem [shape: f32[2,32,16], index: 9, kind: output, shape index: {}]  }
   0x1 LB: > { %s1247_s10 = sadd.s32 4294967295, %s1437_s30   ;;  %p1251_p0 = scmp.ge.s32.totalorder %s1437_s30, 1  ;;  %s1437_s30 = sphi %s1503_s30, %s19_s30  }
   0x2   : > { %p287_p1 = scmp.lt.s32.totalorder %s1437_s30, 3 }
   0x4   : > { %p288_p2 = pnand %p1251_p0, %p287_p1 }
   0x5   : > { %p323_p3 = scmp.lt.s32.totalorder (!%p288_p2), %s1247_s10, 1  ;;  %v1439_v0 = vmov (!%p288_p2), 0   ;;  %v1440_v1 = vmov (!%p288_p2), 1   ;;  %s1441_s15 = smov (!%p288_p2), 16   ;;  %v338_v6 = vld [vmem:[%s1946_s1 + $0x8] sm:$0xff] (!%p288_p2)  ;;  %v340_v7 = vld [vmem:[%s1946_s1 + $0x18] sm:$0xff] (!%p288_p2) }
   0x6   : > { %291 = sbr.rel (%p288_p2) target bundleno = 1379 (0x563), region = 56  ;;  %1388 = vset.pattern.permute.xlu1 (!%p288_p2), %v1439_v0  ;;  %1390 = vset.pattern.permute.xlu0 (!%p288_p2), %v1440_v1  ;;  %v337_v8 = vld [vmem:[%s1946_s1] sm:$0xff] (!%p288_p2)  ;;  %v339_v9 = vld [vmem:[%s1946_s1 + $0x10] sm:$0xff] (!%p288_p2)  ;;  %v1442_v10 = vmov (!%p288_p2), 2   ;;  %v1443_v11 = vmov (!%p288_p2), 4   ;;  %v1444_v12 = vmov (!%p288_p2), 3  }
   0x7   : > { %vm343_vm0 = vcmask (!%p288_p2), 1047680   ;;  %v1445_v19 = vmov (!%p288_p2), 5   ;;  %v1446_v22 = vmov (!%p288_p2), 6   ;;  %s1447_s24 = smov (!%p288_p2), 114   ;;  %s1448_s25 = smov (!%p288_p2), 115   ;;  %vm664_vm13 = vcmask (!%p288_p2), 130048  }
   0x8   : > { %s1449_s26 = smov (!%p288_p2), 113   ;;  %s1450_s27 = smov (!%p288_p2), 127   ;;  %vm828_vm14 = vcmask (!%p288_p2), 261120   ;;  %vm1058_vm15 = vcmask (!%p288_p2), 523264  }
   0x9   : > { %s1451_s28 = smov (!%p288_p2), 126   ;;  %s1452_s29 = smov (!%p288_p2), 125  }
   0xd   : > { %s1962_s10 = smov (!%p323_p3, %s1247_s10), 1 }
   0xe   : > { %s1270_s11 = sshll.u32 %s1962_s10, 5 }
   0xf   : > { %s1520_s14 = scalar_lea.vmem %s1945_s0, %s1270_s11  ;;  %s332_s21 = scalar_lea.vmem %s1954_s9, %s1270_s11 }
  0x10   : > { %v1523_v2 = vld [vmem:[%s1520_s14] sm:$0xff]  ;;  %v1526_v3 = vld [vmem:[%s1520_s14 + $0x10] sm:$0xff]  ;;  %v1533_v4 = vld [vmem:[%s1520_s14 + $0x8] sm:$0xff] }
  0x11   : > { %344 = vrot.lane.b32.xlu0 %v1523_v2, %s1441_s15  ;;  %350 = vrot.lane.b32.xlu1 %v1526_v3, %s1441_s15  ;;  %v1536_v5 = vld [vmem:[%s1520_s14 + $0x18] sm:$0xff] }
  0x15   : > { %347 = vrot.lane.b32.xlu0 %v1533_v4, %s1441_s15  ;;  %353 = vrot.lane.b32.xlu1 %v1536_v5, %s1441_s15 }
  0x19   : > { %399 = vperm.xlu1 %1388, %v338_v6   ;;  %445 = vperm.xlu0 %1390, %v338_v6  }
  0x1d   : > { %1389 = vset.pattern.permute.xlu1 %v1440_v1  ;;  %453 = vperm.xlu0 %1390, %v340_v7  }
  0x1e   : > { %441 = vperm.xlu1 %1389, %v337_v8  }
  0x21   : > { %1395 = vset.pattern.permute.xlu0 %v1442_v10 }
  0x22   : > { %1391 = vset.pattern.permute.xlu1 %v1439_v0  ;;  %485 = vperm.xlu0 %1395, %v337_v8  }
  0x23   : > { %404 = vperm.xlu1 %1391, %v339_v9  }
  0x26   : > { %497 = vperm.xlu0 %1395, %v340_v7  }
  0x27   : > { %1392 = vset.pattern.permute.xlu1 %v1440_v1  ;;  %v341_v1 = vlaneseq }
  0x28   : > { %449 = vperm.xlu1 %1392, %v339_v9  }
  0x2a   : > { %1399 = vset.pattern.permute.xlu0 %v1443_v11 }
  0x2b   : > { %557 = vperm.xlu0 %1399, %v338_v6  }
  0x2c   : > { %1393 = vset.pattern.permute.xlu1 %v1442_v10 }
  0x2d   : > { %489 = vperm.xlu1 %1393, %v338_v6  }
  0x2f   : > { %1400 = vset.pattern.permute.xlu0 %v1444_v12 }
  0x30   : > { %513 = vperm.xlu0 %1400, %v338_v6  }
  0x31   : > { %1394 = vset.pattern.permute.xlu1 %v1439_v0 }
  0x32   : > { %409 = vperm.xlu1 %1394, %v340_v7  }
  0x36   : > { %1396 = vset.pattern.permute.xlu1 %v1442_v10 }
  0x37   : > { %493 = vperm.xlu1 %1396, %v339_v9  }
  0x3b   : > { %1397 = vset.pattern.permute.xlu1 %v1444_v12 }
  0x3c   : > { %509 = vperm.xlu1 %1397, %v337_v8  }
  0x40   : > { %517 = vperm.xlu1 %1397, %v339_v9  }
  0x44   : > { %1398 = vset.pattern.permute.xlu1 %v1443_v11 }
  0x45   : > { %553 = vperm.xlu1 %1398, %v337_v8  }
  0x83   : > { %v345_v13 = vpop.permute.xlu0 %344  ;;  %v351_v14 = vpop.permute.xlu1 %350 }
  0x84   : > { %v346_v15 = vsel %vm343_vm0, %v345_v13, %v1523_v2  ;;  %v352_v16 = vsel %vm343_vm0, %v351_v14, %v1526_v3 }
  0x85   : > { %356 = vrot.lane.b32.xlu0 %v346_v15, %s1441_s15 }
  0x87   : > { %v348_v17 = vpop.permute.xlu0 %347  ;;  %v354_v20 = vpop.permute.xlu1 %353 }
  0x88   : > { %v349_v18 = vsel %vm343_vm0, %v348_v17, %v1533_v4  ;;  %v355_v21 = vsel %vm343_vm0, %v354_v20, %v1536_v5 }
  0x89   : > { %360 = vrot.lane.b32.xlu0 %v352_v16, %s1441_s15  ;;  %358 = vrot.lane.b32.xlu1 %v349_v18, %s1441_s15 }
  0x8d   : > { %521 = vperm.xlu0 %1400, %v340_v7   ;;  %561 = vperm.xlu1 %1398, %v339_v9  }
  0x91   : > { %1401 = vset.pattern.permute.xlu1 %v1445_v19  ;;  %1402 = vset.pattern.permute.xlu0 %v1445_v19 }
  0x92   : > { %597 = vperm.xlu1 %1401, %v337_v8   ;;  %601 = vperm.xlu0 %1402, %v338_v6  }
  0x96   : > { %1403 = vset.pattern.permute.xlu1 %v1443_v11  ;;  %605 = vperm.xlu0 %1402, %v339_v9  }
  0x97   : > { %565 = vperm.xlu1 %1403, %v340_v7  }
  0x98   : > { %v1570_v23 = vpop.permute.xlu1 %399  ;;  %v1578_v27 = vpop.permute.xlu0 %445 }
  0x9a   : > { %1405 = vset.pattern.permute.xlu0 %v1446_v22 }
  0x9b   : > { %362 = vrot.lane.b32.xlu1 %v355_v21, %s1441_s15  ;;  %645 = vperm.xlu0 %1405, %v338_v6  }
  0x9c   : > { %1404 = vset.pattern.permute.xlu1 %v1446_v22  ;;  %v1582_v29 = vpop.permute.xlu0 %453 }
  0x9d   : > { %v1572_v24 = vpop.permute.xlu1 %441 }
  0x9f   : > { %649 = vperm.xlu0 %1405, %v339_v9   ;;  %641 = vperm.xlu1 %1404, %v337_v8  }
  0xa1   : > { %v1586_v31 = vpop.permute.xlu0 %485 }
  0xa2   : > { %v1574_v25 = vpop.permute.xlu1 %404 }
  0xa3   : > { %653 = vperm.xlu0 %1405, %v340_v7   ;;  %1406 = vset.pattern.permute.xlu1 %v1445_v19 }
  0xa4   : > { %609 = vperm.xlu1 %1406, %v340_v7   ;;  %v342_v7 = vand.u32 127, %v341_v1 }
  0xa5   : > { %v1590_v33 = vpop.permute.xlu0 %497 }
  0xa6   : > { %v368_v10 = vadd.s32 4294967293, %v342_v7  ;;  %v420_v11 = vadd.s32 4294967294, %v342_v7  ;;  %v464_v13 = vadd.s32 4294967295, %v342_v7 }
  0xa7   : > { %1407 = vset.pattern.permute.xlu0 %v1439_v0  ;;  %v1576_v26 = vpop.permute.xlu1 %449 }
  0xa8   : > { %394 = vperm.xlu0 %1407, %v337_v8   ;;  %1408 = vset.pattern.permute.xlu1 %v1439_v0  ;;  %vm369_vm1 = vcmp.ge.s32.totalorder %v368_v10, 0  ;;  %vm370_vm2 = vcmp.lt.s32.totalorder %v368_v10, 16  ;;  %vm421_vm3 = vcmp.ge.s32.totalorder %v420_v11, 0  ;;  %vm422_vm4 = vcmp.lt.s32.totalorder %v420_v11, 16 }
  0xa9   : > { %vm1638_vm5 = vmand %vm369_vm1, %vm370_vm2  ;;  %vm465_vm6 = vcmp.ge.s32.totalorder %v464_v13, 0  ;;  %vm466_vm7 = vcmp.lt.s32.totalorder %v464_v13, 16 }
  0xaa   : > { %v1594_v35 = vpop.permute.xlu0 %557  ;;  %vm1642_vm8 = vmand %vm421_vm3, %vm422_vm4 }
  0xab   : > { %vm1646_vm9 = vmand %vm465_vm6, %vm466_vm7 }
  0xac   : > { %v1580_v28 = vpop.permute.xlu1 %489 }
  0xaf   : > { %v1598_v37 = vpop.permute.xlu0 %513 }
  0xb1   : > { %v1584_v30 = vpop.permute.xlu1 %409 }
  0xb6   : > { %v1588_v32 = vpop.permute.xlu1 %493 }
  0xbb   : > { %v1592_v34 = vpop.permute.xlu1 %509 }
  0xbf   : > { %v1596_v36 = vpop.permute.xlu1 %517 }
  0xc4   : > { %v1600_v38 = vpop.permute.xlu1 %553 }
  0xf7   : > { %v357_v39 = vpop.permute.xlu0 %356 }
  0xf8   : > { %v364_v40 = vsel %vm343_vm0, %v357_v39, %v1523_v2 }
  0xf9   : > { %424 = vrot.lane.b32.xlu0 %v364_v40, %s1447_s24  ;;  %376 = vrot.lane.b32.xlu1 %v364_v40, %s1448_s25 }
  0xfb   : > { %v359_v41 = vpop.permute.xlu1 %358  ;;  %v361_v42 = vpop.permute.xlu0 %360 }
  0xfc   : > { %v365_v43 = vsel %vm343_vm0, %v359_v41, %v1533_v4  ;;  %v366_v44 = vsel %vm343_vm0, %v361_v42, %v1526_v3 }
  0xfd   : > { %468 = vrot.lane.b32.xlu0 %v364_v40, %s1449_s26  ;;  %378 = vrot.lane.b32.xlu1 %v365_v43, %s1448_s25 }
 0x101   : > { %426 = vrot.lane.b32.xlu1 %v365_v43, %s1447_s24  ;;  %472 = vrot.lane.b32.xlu0 %v366_v44, %s1449_s26 }
 0x105   : > { %538 = vrot.lane.b32.xlu0 %v365_v43, %s1450_s27  ;;  %380 = vrot.lane.b32.xlu1 %v366_v44, %s1448_s25 }
 0x109   : > { %580 = vrot.lane.b32.xlu0 %v364_v40, %s1451_s28  ;;  %428 = vrot.lane.b32.xlu1 %v366_v44, %s1447_s24 }
 0x10c   : > { %v1611_v45 = vpop.permute.xlu1 %561  ;;  %v1620_v50 = vpop.permute.xlu0 %521 }
 0x10d   : > { %584 = vrot.lane.b32.xlu0 %v366_v44, %s1451_s28  ;;  %470 = vrot.lane.b32.xlu1 %v365_v43, %s1449_s26 }
 0x111   : > { %v1613_v46 = vpop.permute.xlu1 %597  ;;  %626 = vrot.lane.b32.xlu0 %v365_v43, %s1452_s29  ;;  %v1622_v51 = vpop.permute.xlu0 %601 }
 0x115   : > { %628 = vrot.lane.b32.xlu0 %v366_v44, %s1452_s29  ;;  %v1626_v53 = vpop.permute.xlu0 %605 }
 0x116   : > { %v1615_v47 = vpop.permute.xlu1 %565 }
 0x11a   : > { %v363_v48 = vpop.permute.xlu1 %362  ;;  %v1630_v55 = vpop.permute.xlu0 %645 }
 0x11b   : > { %v367_v49 = vsel %vm343_vm0, %v363_v48, %v1536_v5 }
 0x11c   : > { %382 = vrot.lane.b32.xlu1 %v367_v49, %s1448_s25 }
 0x11e   : > { %v1624_v52 = vpop.permute.xlu1 %641  ;;  %v1632_v57 = vpop.permute.xlu0 %649 }
 0x120   : > { %430 = vrot.lane.b32.xlu1 %v367_v49, %s1447_s24 }
 0x122   : > { %v1634_v59 = vpop.permute.xlu0 %653 }
 0x123   : > { %v1628_v54 = vpop.permute.xlu1 %609 }
 0x124   : > { %474 = vrot.lane.b32.xlu1 %v367_v49, %s1449_s26 }
 0x127   : > { %v395_v61 = vpop.permute.xlu0 %394 }
 0x128   : > { %536 = vrot.lane.b32.xlu1 %v364_v40, %s1450_s27 }
 0x12c   : > { %540 = vrot.lane.b32.xlu1 %v366_v44, %s1450_s27 }
 0x130   : > { %582 = vrot.lane.b32.xlu1 %v365_v43, %s1451_s28 }
 0x134   : > { %542 = vrot.lane.b32.xlu1 %v367_v49, %s1450_s27 }
 0x138   : > { %624 = vrot.lane.b32.xlu1 %v364_v40, %s1452_s29 }
 0x13c   : > { %586 = vrot.lane.b32.xlu1 %v367_v49, %s1451_s28 }
 0x140   : > { %630 = vrot.lane.b32.xlu1 %v367_v49, %s1452_s29 }
 0x16b   : > { %v377_v56 = vpop.permute.xlu1 %376  ;;  %v425_v63 = vpop.permute.xlu0 %424 }
 0x16c   : > { %v388_v21 = vsel %vm1638_vm5, %v377_v56, 0.0  ;;  %v436_v22 = vsel %vm1642_vm8, %v425_v63, 0.0  ;;  %v532_v63 = vadd.s32 1, %v342_v7 }
 0x16d   : > { %v412_v56 = vmul.f32 %v395_v61, %v388_v21 }
 0x16e   : > { %vm534_vm10 = vcmp.lt.s32.totalorder %v532_v63, 16 }
 0x16f   : > { %v379_v58 = vpop.permute.xlu1 %378  ;;  %v469_v6 = vpop.permute.xlu0 %468 }
 0x170   : > { %v389_v41 = vsel %vm1638_vm5, %v379_v58, 0.0  ;;  %v480_v43 = vsel %vm1646_vm9, %v469_v6, 0.0 }
 0x171   : > { %v413_v58 = vmul.f32 %v1570_v23, %v389_v41 }
 0x173   : > { %v427_v60 = vpop.permute.xlu1 %426  ;;  %v473_v9 = vpop.permute.xlu0 %472 }
 0x174   : > { %v437_v20 = vsel %vm1642_vm8, %v427_v60, 0.0  ;;  %v456_v60 = vmul.f32 %v1572_v24, %v436_v22 }
 0x175   : > { %v457_v44 = vmul.f32 %v1578_v27, %v437_v20  ;;  %v482_v27 = vsel %vm1646_vm9, %v473_v9, 0.0  ;;  %v525_v9 = vmul.f32 %v1598_v37, %v1533_v4 }
 0x176   : > { %v460_v24 = vadd.f32 %v456_v60, %v412_v56  ;;  %v502_v23 = vmul.f32 %v1588_v32, %v482_v27 }
 0x177   : > { %v381_v62 = vpop.permute.xlu1 %380  ;;  %v539_v14 = vpop.permute.xlu0 %538  ;;  %v461_v10 = vadd.f32 %v457_v44, %v413_v58 }
 0x178   : > { %v390_v48 = vsel %vm1638_vm5, %v381_v62, 0.0  ;;  %v1675_v62 = vadd.s32 2, %v342_v7  ;;  %v549_v21 = vsel %vm534_vm10, %v539_v14, 0.0 }
 0x179   : > { %v414_v6 = vmul.f32 %v1574_v25, %v390_v48  ;;  %v524_v25 = vmul.f32 %v1592_v34, %v1523_v2  ;;  %v526_v2 = vmul.f32 %v1596_v36, %v1526_v3  ;;  %v569_v17 = vmul.f32 %v1594_v35, %v549_v21 }
 0x17a   : > { %vm578_vm11 = vcmp.lt.s32.totalorder %v1675_v62, 16 }
 0x17b   : > { %v429_v0 = vpop.permute.xlu1 %428  ;;  %v581_v40 = vpop.permute.xlu0 %580 }
 0x17c   : > { %v438_v39 = vsel %vm1642_vm8, %v429_v0, 0.0 }
 0x17d   : > { %v458_v0 = vmul.f32 %v1576_v26, %v438_v39 }
 0x17f   : > { %v471_v8 = vpop.permute.xlu1 %470  ;;  %v585_v61 = vpop.permute.xlu0 %584  ;;  %v462_v13 = vadd.f32 %v458_v0, %v414_v6 }
 0x180   : > { %v481_v42 = vsel %vm1646_vm9, %v471_v8, 0.0  ;;  %v500_v8 = vmul.f32 %v1586_v31, %v480_v43  ;;  %v594_v16 = vsel %vm578_vm11, %v585_v61, 0.0 }
 0x181   : > { %v501_v1 = vmul.f32 %v1580_v28, %v481_v42  ;;  %v1678_v28 = vadd.s32 3, %v342_v7  ;;  %v506_v39 = vadd.f32 %v502_v23, %v462_v13  ;;  %v614_v0 = vmul.f32 %v1626_v53, %v594_v16 }
 0x182   : > { %v504_v20 = vadd.f32 %v500_v8, %v460_v24 }
 0x183   : > { %v505_v26 = vadd.f32 %v501_v1, %v461_v10  ;;  %v627_v42 = vpop.permute.xlu0 %626  ;;  %vm622_vm12 = vcmp.lt.s32.totalorder %v1678_v28, 16  ;;  %v780_v28 = vld [vmem:[%s1950_s5] sm:$0xff] }
 0x185   : > { %v529_v34 = vadd.f32 %v525_v9, %v505_v26 }
 0x187   : > { %v573_v35 = vadd.f32 %v569_v17, %v529_v34  ;;  %v1156_v34 = vld [vmem:[%s1953_s8] sm:$0xff] }
 0x18e   : > { %v1636_v12 = vpop.permute.xlu1 %382 }
 0x18f   : > { %v391_v37 = vsel %vm1638_vm5, %v1636_v12, 0.0  ;;  %v530_v12 = vadd.f32 %v526_v2, %v506_v39  ;;  %v1036_v2 = vld [vmem:[%s1952_s7 + $0x10] sm:$0xff] }
 0x190   : > { %v415_v19 = vmul.f32 %v1584_v30, %v391_v37 }
 0x192   : > { %v431_v15 = vpop.permute.xlu1 %430 }
 0x193   : > { %v439_v41 = vsel %vm1642_vm8, %v431_v15, 0.0  ;;  %v528_v15 = vadd.f32 %v524_v25, %v504_v20 }
 0x194   : > { %v459_v43 = vmul.f32 %v1582_v29, %v439_v41  ;;  %v637_v29 = vsel %vm622_vm12, %v627_v42, 0.0  ;;  %v784_v41 = vld [vmem:[%s1950_s5 + $0x20] sm:$0xff]  ;;  %v1158_v42 = vld [vmem:[%s1953_s8 + $0x10] sm:$0xff] }
 0x196   : > { %v475_v18 = vpop.permute.xlu1 %474 }
 0x197   : > { %v483_v14 = vsel %vm1646_vm9, %v475_v18, 0.0 }
 0x198   : > { %v503_v18 = vmul.f32 %v1590_v33, %v483_v14  ;;  %v657_v33 = vmul.f32 %v1630_v55, %v637_v29 }
 0x19a   : > { %v537_v49 = vpop.permute.xlu1 %536 }
 0x19b   : > { %v548_v31 = vsel %vm534_vm10, %v537_v49, 0.0  ;;  %v463_v49 = vadd.f32 %v459_v43, %v415_v19 }
 0x19c   : > { %v568_v4 = vmul.f32 %v1600_v38, %v548_v31  ;;  %v592_v38 = vsel %vm578_vm11, %v581_v40, 0.0 }
 0x19d   : > { %v507_v1 = vadd.f32 %v503_v18, %v463_v49 }
 0x19e   : > { %v541_v11 = vpop.permute.xlu1 %540  ;;  %v572_v48 = vadd.f32 %v568_v4, %v528_v15 }
 0x19f   : > { %v550_v32 = vsel %vm534_vm10, %v541_v11, 0.0 }
 0x1a0   : > { %v570_v3 = vmul.f32 %v1611_v45, %v550_v32  ;;  %v612_v45 = vmul.f32 %v1613_v46, %v592_v38  ;;  %v527_v46 = vmul.f32 %v1620_v50, %v1536_v5  ;;  %v786_v32 = vld [vmem:[%s1950_s5 + $0x30] sm:$0xff] }
 0x1a2   : > { %v583_v22 = vpop.permute.xlu1 %582  ;;  %v574_v56 = vadd.f32 %v570_v3, %v530_v12  ;;  %v616_v8 = vadd.f32 %v612_v45, %v572_v48  ;;  %v531_v13 = vadd.f32 %v527_v46, %v507_v1  ;;  %v718_v1 = vld [vmem:[%s1947_s2 + $0x10] sm:$0xff]  ;;  %v747_v46 = vld [vmem:[%s1948_s3 + $0x18] sm:$0xff] }
 0x1a3   : > { %v593_v7 = vsel %vm578_vm11, %v583_v22, 0.0 }
 0x1a4   : > { %v613_v36 = vmul.f32 %v1622_v51, %v593_v7  ;;  %v629_v51 = vpop.permute.xlu0 %628  ;;  %v618_v27 = vadd.f32 %v614_v0, %v574_v56  ;;  %v1034_v7 = vld [vmem:[%s1952_s7] sm:$0xff] }
 0x1a5   : > { %v638_v10 = vsel %vm622_vm12, %v629_v51, 0.0 }
 0x1a6   : > { %v543_v44 = vpop.permute.xlu1 %542  ;;  %v617_v60 = vadd.f32 %v613_v36, %v573_v35  ;;  %v658_v24 = vmul.f32 %v1632_v57, %v638_v10  ;;  %v781_v10 = vld [vmem:[%s1950_s5 + $0x8] sm:$0xff] }
 0x1a7   : > { %v551_v58 = vsel %vm534_vm10, %v543_v44, 0.0 }
 0x1a8   : > { %v661_v61 = vadd.f32 %v657_v33, %v617_v60  ;;  %v571_v53 = vmul.f32 %v1615_v47, %v551_v58  ;;  %v662_v20 = vadd.f32 %v658_v24, %v618_v27  ;;  %v717_v58 = vld [vmem:[%s1947_s2 + $0x8] sm:$0xff]  ;;  %v783_v27 = vld [vmem:[%s1950_s5 + $0x18] sm:$0xff] }
 0x1a9   : > { %v745_v33 = vld [vmem:[%s1948_s3 + $0x8] sm:$0xff]  ;;  %v1159_v24 = vld [vmem:[%s1953_s8 + $0x18] sm:$0xff] }
 0x1aa   : > { %v625_v40 = vpop.permute.xlu1 %624  ;;  %v575_v50 = vadd.f32 %v571_v53, %v531_v13  ;;  %v666_v23 = vsel %vm664_vm13, %v661_v61, 0.0  ;;  %v668_v57 = vsel %vm664_vm13, %v662_v20, 0.0  ;;  %v787_v53 = vld [vmem:[%s1950_s5 + $0x38] sm:$0xff]  ;;  %v772_v13 = vld [vmem:[%s1949_s4] sm:$0xff] }
 0x1ab   : > { %v636_v30 = vsel %vm622_vm12, %v625_v40, 0.0  ;;  %1304 = vmatprep.mubr.msk.f32.mxu0 %vm828_vm14, %v772_v13 }
 0x1ac   : > { %v656_v6 = vmul.f32 %v1624_v52, %v636_v30  ;;  %v744_v30 = vld [vmem:[%s1948_s3] sm:$0xff] }
 0x1ae   : > { %v660_v63 = vadd.f32 %v656_v6, %v616_v8  ;;  %v587_v11 = vpop.permute.xlu1 %586  ;;  %v719_v8 = vld [vmem:[%s1947_s2 + $0x18] sm:$0xff]  ;;  %v746_v6 = vld [vmem:[%s1948_s3 + $0x10] sm:$0xff] }
 0x1af   : > { %v595_v55 = vsel %vm578_vm11, %v587_v11, 0.0  ;;  %v1037_v11 = vld [vmem:[%s1952_s7 + $0x18] sm:$0xff] }
 0x1b0   : > { %v665_v52 = vsel %vm664_vm13, %v660_v63, 0.0  ;;  %v615_v5 = vmul.f32 %v1628_v54, %v595_v55  ;;  %v716_v54 = vld [vmem:[%s1947_s2] sm:$0xff]  ;;  %v1157_v55 = vld [vmem:[%s1953_s8 + $0x8] sm:$0xff] }
 0x1b1   : > { %v667_v31 = vadd.f32 %v666_v23, %v665_v52 }
 0x1b2   : > { %v631_v26 = vpop.permute.xlu1 %630  ;;  %v619_v25 = vadd.f32 %v615_v5, %v575_v50 }
 0x1b3   : > { %v639_v47 = vsel %vm622_vm12, %v631_v26, 0.0  ;;  %v669_v21 = vadd.f32 %v668_v57, %v667_v31 }
 0x1b4   : > { %v659_v62 = vmul.f32 %v1634_v59, %v639_v47  ;;  %v782_v59 = vld [vmem:[%s1950_s5 + $0x10] sm:$0xff] }
 0x1b6   : > { %v663_v9 = vadd.f32 %v659_v62, %v619_v25 }
 0x1b8   : > { %v670_v22 = vsel %vm664_vm13, %v663_v9, 0.0 }
 0x1b9   : > { %v671_v39 = vadd.f32 %v670_v22, %v669_v21 }
 0x1bb   : > { %672 = vadd.xlane.f32.xlu0 %v671_v39 }
 0x1d1   : > { %722 = vperm.xlu0 %1407, %v716_v54  }
 0x1d5   : > { %790 = vperm.xlu0 %1407, %v780_v28  }
 0x1d9   : > { %800 = vperm.xlu0 %1407, %v782_v59  }
 0x1dd   : > { %810 = vperm.xlu0 %1407, %v784_v41  }
 0x1e1   : > { %820 = vperm.xlu0 %1407, %v786_v32  }
 0x1e5   : > { %1040 = vperm.xlu0 %1407, %v1034_v7  }
 0x1e9   : > { %1050 = vperm.xlu0 %1407, %v1036_v2  }
 0x1ed   : > { %1162 = vperm.xlu0 %1407, %v1156_v34  }
 0x1f1   : > { %1172 = vperm.xlu0 %1407, %v1158_v42  }
 0x248   : > { %v673_v4 = vpop.xlane.xlu0 %672 }
 0x249   : > { %v674_v37 = vrot.slane %v673_v4, 4 }
 0x24b   : > { %v675_v14 = vadd.f32 %v674_v37, %v673_v4 }
 0x24d   : > { %v676_v15 = vrot.slane %v675_v14, 2 }
 0x24f   : > { %v677_v17 = vadd.f32 %v676_v15, %v675_v14 }
 0x250   : > { %v723_v2 = vpop.permute.xlu0 %722 }
 0x251   : > { %v678_v43 = vrot.slane %v677_v17, 1 }
 0x253   : > { %v679_v3 = vadd.f32 %v678_v43, %v677_v17 }
 0x255   : > { %1362 = vpush %v679_v3 }
 0x286   : > { %s1363_s13 = spop %1362 }
 0x287   : > { %v681_v36 = vstv %s1363_s13 }
 0x288   : > { %v683_v44 = vmul.f32 0.001953125, %v681_v36 }
 0x28a   : > { %v1763_v38 = vsub.f32 %v660_v63, %v683_v44  ;;  %v1765_v16 = vsub.f32 %v661_v61, %v683_v44  ;;  %v1767_v12 = vsub.f32 %v662_v20, %v683_v44  ;;  %v1769_v19 = vsub.f32 %v663_v9, %v683_v44  ;;  %v785_v61 = vld [vmem:[%s1950_s5 + $0x28] sm:$0xff] }
 0x28b   : > { %v1035_v63 = vld [vmem:[%s1952_s7 + $0x8] sm:$0xff] }
 0x28c   : > { %v688_v18 = vmul.f32 %v1763_v38, %v1763_v38  ;;  %v689_v48 = vmul.f32 %v1765_v16, %v1765_v16  ;;  %v690_v35 = vmul.f32 %v1767_v12, %v1767_v12  ;;  %v691_v29 = vmul.f32 %v1769_v19, %v1769_v19 }
 0x28e   : > { %v692_v45 = vsel %vm664_vm13, %v688_v18, 0.0  ;;  %v693_v51 = vsel %vm664_vm13, %v689_v48, 0.0  ;;  %v695_v56 = vsel %vm664_vm13, %v690_v35, 0.0  ;;  %v697_v40 = vsel %vm664_vm13, %v691_v29, 0.0  ;;  %v777_v18 = vld [vmem:[%s1949_s4 + $0x28] sm:$0xff]  ;;  %v778_v48 = vld [vmem:[%s1949_s4 + $0x30] sm:$0xff] }
 0x28f   : > { %v694_v49 = vadd.f32 %v693_v51, %v692_v45  ;;  %v779_v35 = vld [vmem:[%s1949_s4 + $0x38] sm:$0xff]  ;;  %v1030_v29 = vld [vmem:[%s1951_s6] sm:$0xff]  ;;  %v791_v51 = vpop.permute.xlu0 %790 }
 0x290   : > { %1332 = vmatprep.mubr.msk.f32.mxu1 %vm1058_vm15, %v1030_v29 }
 0x291   : > { %v696_v60 = vadd.f32 %v695_v56, %v694_v49 }
 0x293   : > { %v698_v0 = vadd.f32 %v697_v40, %v696_v60  ;;  %v801_v60 = vpop.permute.xlu0 %800 }
 0x295   : > { %699 = vadd.xlane.f32.xlu1 %v698_v0 }
 0x2a6   : > { %727 = vperm.xlu1 %1408, %v717_v58  }
 0x2aa   : > { %750 = vperm.xlu1 %1408, %v744_v30  }
 0x2ae   : > { %755 = vperm.xlu1 %1408, %v745_v33  }
 0x2b2   : > { %732 = vperm.xlu1 %1408, %v718_v1  }
 0x2b6   : > { %737 = vperm.xlu1 %1408, %v719_v8  }
 0x2ba   : > { %760 = vperm.xlu1 %1408, %v746_v6  }
 0x2be   : > { %765 = vperm.xlu1 %1408, %v747_v46  }
 0x2c2   : > { %795 = vperm.xlu1 %1408, %v781_v10  }
 0x2c6   : > { %805 = vperm.xlu1 %1408, %v783_v27  }
 0x2ca   : > { %815 = vperm.xlu1 %1408, %v785_v61  }
 0x2ce   : > { %825 = vperm.xlu1 %1408, %v787_v53   ;;  %v811_v53 = vpop.permute.xlu0 %810 }
 0x2d2   : > { %1045 = vperm.xlu1 %1408, %v1035_v63  }
 0x2d6   : > { %1055 = vperm.xlu1 %1408, %v1037_v11  }
 0x2da   : > { %1167 = vperm.xlu1 %1408, %v1157_v55  }
 0x2de   : > { %1177 = vperm.xlu1 %1408, %v1159_v24  }
 0x322   : > { %v700_v52 = vpop.xlane.xlu1 %699 }
 0x323   : > { %v701_v5 = vrot.slane %v700_v52, 4 }
 0x325   : > { %v702_v50 = vadd.f32 %v701_v5, %v700_v52 }
 0x326   : > { %v728_v31 = vpop.permute.xlu1 %727 }
 0x327   : > { %v703_v26 = vrot.slane %v702_v50, 2 }
 0x329   : > { %v704_v20 = vadd.f32 %v703_v26, %v702_v50 }
 0x32a   : > { %v751_v25 = vpop.permute.xlu1 %750 }
 0x32b   : > { %v705_v23 = vrot.slane %v704_v20, 1 }
 0x32d   : > { %v706_v47 = vadd.f32 %v705_v23, %v704_v20 }
 0x32e   : > { %v756_v62 = vpop.permute.xlu1 %755 }
 0x32f   : > { %1364 = vpush %v706_v47 }
 0x332   : > { %v733_v57 = vpop.permute.xlu1 %732 }
 0x336   : > { %v738_v39 = vpop.permute.xlu1 %737 }
 0x33a   : > { %v761_v54 = vpop.permute.xlu1 %760 }
 0x33e   : > { %v766_v14 = vpop.permute.xlu1 %765 }
 0x342   : > { %v796_v45 = vpop.permute.xlu1 %795 }
 0x346   : > { %v806_v49 = vpop.permute.xlu1 %805 }
 0x34a   : > { %v816_v10 = vpop.permute.xlu1 %815 }
 0x360   : > { %s1365_s12 = spop %1364 }
 0x361   : > { %v708_v9 = vstv %s1365_s12 }
 0x362   : > { %v709_v21 = vmul.f32 0.001953125, %v708_v9  ;;  %v826_v9 = vpop.permute.xlu1 %825 }
 0x364   : > { %v710_v22 = vadd.f32 1e-05, %v709_v21 }
 0x366   : > { %1409 = vrsqrt.f32 %v710_v22 }
 0x370   : > { %v1410_v28 = vpop.eup %1409 }
 0x371   : > { %v712_v59 = vmul.f32 %v1410_v28, %v1763_v38  ;;  %v713_v41 = vmul.f32 %v1410_v28, %v1765_v16  ;;  %v714_v32 = vmul.f32 %v1410_v28, %v1767_v12  ;;  %v715_v7 = vmul.f32 %v1410_v28, %v1769_v19  ;;  %v773_v38 = vld [vmem:[%s1949_s4 + $0x8] sm:$0xff]  ;;  %v774_v16 = vld [vmem:[%s1949_s4 + $0x10] sm:$0xff]  ;;  %v775_v12 = vld [vmem:[%s1949_s4 + $0x18] sm:$0xff] }
 0x372   : > { %v776_v19 = vld [vmem:[%s1949_s4 + $0x20] sm:$0xff] }
 0x373   : > { %v740_v34 = vmul.f32 %v723_v2, %v712_v59  ;;  %v741_v42 = vmul.f32 %v728_v31, %v713_v41  ;;  %v742_v4 = vmul.f32 %v733_v57, %v714_v32  ;;  %v743_v37 = vmul.f32 %v738_v39, %v715_v7 }
 0x375   : > { %v768_v15 = vadd.f32 %v751_v25, %v740_v34  ;;  %v769_v17 = vadd.f32 %v756_v62, %v741_v42  ;;  %v770_v43 = vadd.f32 %v761_v54, %v742_v4  ;;  %v771_v3 = vadd.f32 %v766_v14, %v743_v37  ;;  %v821_v54 = vpop.permute.xlu0 %820 }
 0x377   : > { %v1338_v36 = vpack.c.bf16 %v769_v17, %v768_v15  ;;  %v1342_v44 = vpack.c.bf16 %v771_v3, %v770_v43 }
 0x379   : > { %1339 = vmatprep.subr.bf16.mxu0 %v1338_v36 }
 0x37a   : > { %1341 = vmatpush3.bf16.msra.mxu0 %v1338_v36 }
 0x37b   : > { %1343 = vmatprep.subr.bf16.mxu0 %v1342_v44 }
 0x37e   : > { %1345 = vmatpush3.bf16.msra.mxu0 %v1342_v44 }
 0x381   : > { %1305 = vmatmul.mubr.msk.f32.vlgmr.msra.gmra.mrb[0].mxu0 %vm828_vm14, %v773_v38 }
 0x382   : > { %1307 = vmatprep.mubr.msk.f32.mxu0 %vm828_vm14, %v774_v16 }
 0x385   : > { %1308 = vmatmul.mubr.msk.f32.gmra.mrb[2].mxu0 %vm828_vm14, %v775_v12 }
 0x386   : > { %1310 = vmatprep.mubr.msk.f32.mxu0 %vm828_vm14, %v776_v19 }
 0x389   : > { %1311 = vmatmul.mubr.msk.f32.gmra.mrb[4].mxu0 %vm828_vm14, %v777_v18 }
 0x38a   : > { %1313 = vmatprep.mubr.msk.f32.mxu0 %vm828_vm14, %v778_v48 }
 0x38d   : > { %1314 = vmatmul.mubr.msk.f32.gmra.mrb[6].mxu0 %vm828_vm14, %v779_v35 }
 0x454   : > { %v1306_v56 = vpop.f32.mrb[0].mxu0 }
 0x455   : > { %v1868_v40 = vadd.f32 %v1306_v56, %v796_v45  ;;  %v919_v0 = vpop.f32.mrb[1].mxu0 }
 0x456   : > { %v1870_v58 = vadd.f32 %v919_v0, %v791_v51 }
 0x457   : > { %v967_v30 = vmul.f32 0.044715, %v1868_v40  ;;  %v959_v51 = vmul.f32 0.5, %v1868_v40 }
 0x458   : > { %v966_v33 = vmul.f32 0.044715, %v1870_v58  ;;  %v1309_v1 = vpop.f32.mrb[2].mxu0 }
 0x459   : > { %v975_v8 = vmul.f32 %v967_v30, %v1868_v40  ;;  %v1875_v6 = vadd.f32 %v1309_v1, %v806_v49  ;;  %v929_v46 = vpop.f32.mrb[3].mxu0 }
 0x45a   : > { %v974_v27 = vmul.f32 %v966_v33, %v1870_v58  ;;  %v1878_v61 = vadd.f32 %v929_v46, %v801_v60  ;;  %v958_v60 = vmul.f32 0.5, %v1870_v58 }
 0x45b   : > { %v969_v63 = vmul.f32 0.044715, %v1875_v6  ;;  %v983_v11 = vmul.f32 %v975_v8, %v1868_v40  ;;  %v961_v46 = vmul.f32 0.5, %v1875_v6 }
 0x45c   : > { %v968_v55 = vmul.f32 0.044715, %v1878_v61  ;;  %v1312_v24 = vpop.f32.mrb[4].mxu0  ;;  %v982_v13 = vmul.f32 %v974_v27, %v1870_v58 }
 0x45d   : > { %v977_v52 = vmul.f32 %v969_v63, %v1875_v6  ;;  %v1885_v5 = vadd.f32 %v1312_v24, %v816_v10  ;;  %v939_v50 = vpop.f32.mrb[5].mxu0  ;;  %v991_v26 = vadd.f32 %v983_v11, %v1868_v40 }
 0x45e   : > { %v976_v20 = vmul.f32 %v968_v55, %v1878_v61  ;;  %v1889_v23 = vadd.f32 %v939_v50, %v811_v53  ;;  %v990_v47 = vadd.f32 %v982_v13, %v1870_v58  ;;  %v960_v53 = vmul.f32 0.5, %v1878_v61 }
 0x45f   : > { %v985_v31 = vmul.f32 %v977_v52, %v1875_v6  ;;  %v971_v25 = vmul.f32 0.044715, %v1885_v5  ;;  %v999_v62 = vmul.f32 0.7978846, %v991_v26  ;;  %v963_v58 = vmul.f32 0.5, %v1885_v5 }
 0x460   : > { %v984_v57 = vmul.f32 %v976_v20, %v1878_v61  ;;  %v970_v21 = vmul.f32 0.044715, %v1889_v23  ;;  %v1315_v22 = vpop.f32.mrb[6].mxu0  ;;  %v998_v39 = vmul.f32 0.7978846, %v990_v47  ;;  %v962_v50 = vmul.f32 0.5, %v1889_v23 }
 0x461   : > { %v979_v28 = vmul.f32 %v971_v25, %v1885_v5  ;;  %v1897_v59 = vadd.f32 %v1315_v22, %v826_v9  ;;  %v949_v41 = vpop.f32.mrb[7].mxu0  ;;  %1411 = vtanh.f32 %v999_v62  ;;  %v993_v32 = vadd.f32 %v985_v31, %v1875_v6 }
 0x462   : > { %v978_v7 = vmul.f32 %v970_v21, %v1889_v23  ;;  %v950_v2 = vadd.f32 %v949_v41, %v821_v54  ;;  %1413 = vtanh.f32 %v998_v39  ;;  %v992_v34 = vadd.f32 %v984_v57, %v1878_v61  ;;  %v1032_v39 = vld [vmem:[%s1951_s6 + $0x10] sm:$0xff]  ;;  %v1033_v54 = vld [vmem:[%s1951_s6 + $0x18] sm:$0xff] }
 0x463   : > { %v987_v42 = vmul.f32 %v979_v28, %v1885_v5  ;;  %v973_v4 = vmul.f32 0.044715, %v1897_v59  ;;  %v1001_v37 = vmul.f32 0.7978846, %v993_v32  ;;  %v965_v61 = vmul.f32 0.5, %v1897_v59  ;;  %v1046_v28 = vpop.permute.xlu1 %1045 }
 0x464   : > { %v986_v14 = vmul.f32 %v978_v7, %v1889_v23  ;;  %v972_v15 = vmul.f32 0.044715, %v950_v2  ;;  %v1000_v17 = vmul.f32 0.7978846, %v992_v34  ;;  %v964_v9 = vmul.f32 0.5, %v950_v2 }
 0x465   : > { %v981_v43 = vmul.f32 %v973_v4, %v1897_v59  ;;  %1415 = vtanh.f32 %v1001_v37  ;;  %v995_v3 = vadd.f32 %v987_v42, %v1885_v5 }
 0x466   : > { %v980_v36 = vmul.f32 %v972_v15, %v950_v2  ;;  %1417 = vtanh.f32 %v1000_v17  ;;  %v994_v44 = vadd.f32 %v986_v14, %v1889_v23  ;;  %v1031_v23 = vld [vmem:[%s1951_s6 + $0x8] sm:$0xff] }
 0x467   : > { %v989_v38 = vmul.f32 %v981_v43, %v1897_v59  ;;  %v1003_v16 = vmul.f32 0.7978846, %v995_v3  ;;  %v1056_v41 = vpop.permute.xlu1 %1055  ;;  %v1427_v43 = vld [vmem:[%s1520_s14 + $0x8] sm:$0xff] }
 0x468   : > { %v988_v12 = vmul.f32 %v980_v36, %v950_v2  ;;  %v1002_v19 = vmul.f32 0.7978846, %v994_v44 }
 0x469   : > { %1419 = vtanh.f32 %v1003_v16  ;;  %v997_v18 = vadd.f32 %v989_v38, %v1897_v59  ;;  %v1041_v59 = vpop.permute.xlu0 %1040  ;;  %v1428_v16 = vld [vmem:[%s1520_s14] sm:$0xff] }
 0x46a   : > { %1421 = vtanh.f32 %v1002_v19  ;;  %v996_v48 = vadd.f32 %v988_v12, %v950_v2 }
 0x46b   : > { %v1412_v35 = vpop.eup %1411  ;;  %v1005_v29 = vmul.f32 0.7978846, %v997_v18  ;;  %v1168_v7 = vpop.permute.xlu1 %1167 }
 0x46c   : > { %v1414_v45 = vpop.eup %1413  ;;  %v1015_v49 = vadd.f32 1.0, %v1412_v35  ;;  %v1004_v56 = vmul.f32 0.7978846, %v996_v48 }
 0x46d   : > { %v1014_v0 = vadd.f32 1.0, %v1414_v45  ;;  %1423 = vtanh.f32 %v1005_v29  ;;  %v1051_v32 = vpop.permute.xlu0 %1050  ;;  %v1429_v29 = vld [vmem:[%s1520_s14 + $0x18] sm:$0xff] }
 0x46e   : > { %v1023_v30 = vmul.f32 %v1015_v49, %v959_v51  ;;  %1425 = vtanh.f32 %v1004_v56  ;;  %v1430_v51 = vld [vmem:[%s1520_s14 + $0x10] sm:$0xff] }
 0x46f   : > { %v1416_v33 = vpop.eup %1415  ;;  %v1022_v1 = vmul.f32 %v1014_v0, %v958_v60  ;;  %v1178_v38 = vpop.permute.xlu1 %1177 }
 0x470   : > { %v1418_v8 = vpop.eup %1417  ;;  %v1017_v10 = vadd.f32 1.0, %v1416_v33 }
 0x471   : > { %v1346_v27 = vpack.c.bf16 %v1023_v30, %v1022_v1  ;;  %v1016_v63 = vadd.f32 1.0, %v1418_v8  ;;  %v1163_v34 = vpop.permute.xlu0 %1162 }
 0x472   : > { %v1025_v11 = vmul.f32 %v1017_v10, %v961_v46 }
 0x473   : > { %v1420_v40 = vpop.eup %1419  ;;  %1347 = vmatprep.subr.bf16.mxu1 %v1346_v27  ;;  %v1024_v55 = vmul.f32 %v1016_v63, %v960_v53 }
 0x474   : > { %v1422_v24 = vpop.eup %1421  ;;  %1349 = vmatpush3.bf16.msra.mxu1 %v1346_v27  ;;  %v1019_v13 = vadd.f32 1.0, %v1420_v40 }
 0x475   : > { %v1350_v52 = vpack.c.bf16 %v1025_v11, %v1024_v55  ;;  %v1018_v26 = vadd.f32 1.0, %v1422_v24  ;;  %v1173_v18 = vpop.permute.xlu0 %1172 }
 0x476   : > { %v1027_v20 = vmul.f32 %v1019_v13, %v963_v58 }
 0x477   : > { %v1424_v6 = vpop.eup %1423  ;;  %1351 = vmatprep.subr.bf16.mxu1 %v1350_v52  ;;  %v1026_v47 = vmul.f32 %v1018_v26, %v962_v50 }
 0x478   : > { %v1426_v31 = vpop.eup %1425  ;;  %1353 = vmatpush3.bf16.msra.mxu1 %v1350_v52  ;;  %v1021_v25 = vadd.f32 1.0, %v1424_v6 }
 0x479   : > { %v1354_v62 = vpack.c.bf16 %v1027_v20, %v1026_v47  ;;  %v1020_v57 = vadd.f32 1.0, %v1426_v31 }
 0x47a   : > { %v1029_v21 = vmul.f32 %v1021_v25, %v965_v61 }
 0x47b   : > { %1355 = vmatprep.subr.bf16.mxu1 %v1354_v62  ;;  %v1028_v5 = vmul.f32 %v1020_v57, %v964_v9 }
 0x47c   : > { %1357 = vmatpush3.bf16.msra.mxu1 %v1354_v62 }
 0x47d   : > { %v1358_v22 = vpack.c.bf16 %v1029_v21, %v1028_v5 }
 0x47f   : > { %1359 = vmatprep.subr.bf16.mxu1 %v1358_v22 }
 0x480   : > { %1361 = vmatpush3.bf16.msra.mxu1 %v1358_v22 }
 0x483   : > { %1333 = vmatmul.mubr.msk.f32.vlgmr.msra.gmra.mrb[0].mxu1 %vm1058_vm15, %v1031_v23 }
 0x484   : > { %1335 = vmatprep.mubr.msk.f32.mxu1 %vm1058_vm15, %v1032_v39 }
 0x487   : > { %1336 = vmatmul.mubr.msk.f32.gmra.mrb[2].mxu1 %vm1058_vm15, %v1033_v54 }
 0x556   : > { %v1334_v2 = vpop.f32.mrb[0].mxu1 }
 0x557   : > { %v1143_v42 = vadd.f32 %v1334_v2, %v1046_v28  ;;  %v1137_v4 = vpop.f32.mrb[1].mxu1 }
 0x558   : > { %v1138_v37 = vadd.f32 %v1137_v4, %v1041_v59 }
 0x559   : > { %v1181_v14 = vmul.f32 %v1168_v7, %v1143_v42 }
 0x55a   : > { %v1180_v15 = vmul.f32 %v1163_v34, %v1138_v37  ;;  %v1337_v17 = vpop.f32.mrb[2].mxu1 }
 0x55b   : > { %v1185_v3 = vadd.f32 %v1427_v43, %v1181_v14  ;;  %v1153_v36 = vadd.f32 %v1337_v17, %v1056_v41  ;;  %v1147_v44 = vpop.f32.mrb[3].mxu1 }
 0x55c   : > { %v1184_v12 = vadd.f32 %v1428_v16, %v1180_v15  ;;  %v1148_v19 = vadd.f32 %v1147_v44, %v1051_v32 }
 0x55d   : > { %1189 = vst.msk [vmem:[%s332_s21 + $0x8] sm:$0xff] %vm664_vm13, %v1185_v3  ;;  %v1183_v48 = vmul.f32 %v1178_v38, %v1153_v36 }
 0x55e   : > { %1188 = vst.msk [vmem:[%s332_s21] sm:$0xff] %vm664_vm13, %v1184_v12  ;;  %v1182_v35 = vmul.f32 %v1173_v18, %v1148_v19 }
 0x55f   : > { %v1187_v45 = vadd.f32 %v1429_v29, %v1183_v48 }
 0x560   : > { %v1186_v49 = vadd.f32 %v1430_v51, %v1182_v35 }
 0x561   : > { %1191 = vst.msk [vmem:[%s332_s21 + $0x18] sm:$0xff] %vm664_vm13, %v1187_v45 }
 0x562   : > { %1190 = vst.msk [vmem:[%s332_s21 + $0x10] sm:$0xff] %vm664_vm13, %v1186_v49 }
 0x563 PF: > { %s19_s30 = sadd.s32 1, %s1437_s30  }
 0x564   : > { %p16_p4 = scmp.ge.s32.totalorder %s19_s30, 4  }
 0x566   :  { %18 = sbr.rel (!%p16_p4) target bundleno = 1 (0x1), region = 86 }

</bundles_post_ra>
